<compile_context>
chip_gen: v7x
topology: tpu7x:2x2x1
jax: 0.10.0
libtpu: 0.0.40
codegen_flags: <defaults>
</compile_context>

<pallas_src>
import functools
import numpy as np

import jax
import jax.numpy as jnp
from jax import lax
from jax.experimental import pallas as pl
from jax.experimental.pallas import tpu as pltpu


# ----------------------------------------------------------------------------
# Shared-range-reduction sincos (Cephes-style f32 polynomials, |r| <= pi/4)
# ----------------------------------------------------------------------------

_TWO_OVER_PI = 0.6366197723675814
# Cody-Waite split of pi/2 (sum == pi/2 to beyond f32 precision)
_PIO2_1 = 1.5703125
_PIO2_2 = 4.837512969970703125e-4
_PIO2_3 = 7.549789948768648e-8


def _sincos(theta):
    """Return (sin(theta), cos(theta)) with a single shared range reduction.

    All VPU ops (mul/add/cmp/select); accurate to ~1-2 f32 ulps for the
    moderate |theta| produced by noise-level embeddings.
    """
    q = jnp.floor(theta * _TWO_OVER_PI + 0.5)              # nearest multiple of pi/2
    r = ((theta - q * _PIO2_1) - q * _PIO2_2) - q * _PIO2_3  # |r| <= pi/4
    n = q.astype(jnp.int32)
    r2 = r * r

    # sin polynomial on the reduced argument
    sp = jnp.float32(-1.9515295891e-4)
    sp = sp * r2 + jnp.float32(8.3321608736e-3)
    sp = sp * r2 + jnp.float32(-1.6666654611e-1)
    s = r + r * r2 * sp

    # cos polynomial on the reduced argument
    cp = jnp.float32(2.443315711809948e-5)
    cp = cp * r2 + jnp.float32(-1.388731625493765e-3)
    cp = cp * r2 + jnp.float32(4.166664568298827e-2)
    c = 1.0 - 0.5 * r2 + r2 * r2 * cp

    swap = (n & 1) == 1                  # odd quadrant: sin/cos swap roles
    sin_flip = (n & 2) == 2
    cos_flip = ((n + 1) & 2) == 2
    sin_base = jnp.where(swap, c, s)
    cos_base = jnp.where(swap, s, c)
    sin_out = jnp.where(sin_flip, -sin_base, sin_base)
    cos_out = jnp.where(cos_flip, -cos_base, cos_base)
    return sin_out, cos_out


# ----------------------------------------------------------------------------
# Kernel
# ----------------------------------------------------------------------------

def _gfp_kernel(x_ref, w_ref, o_ref, *, emb, row_chunk, fast_sincos):
    """Fused Gaussian Fourier embedding.

    x_ref : (TB, 1)   noise levels (one scalar per row)
    w_ref : (1,  E)   fixed Gaussian projection weights
    o_ref : (TB, 2E)  [sin(2*pi*x*W) | cos(2*pi*x*W)]
    """
    two_pi = jnp.float32(2.0 * np.pi)
    w = w_ref[...].astype(jnp.float32)                       # (1, E)
    rows = x_ref.shape[0]

    def compute(x_rows):
        # Scale the (rows, 1) column (cheaper than rescaling W every step).
        proj = (x_rows.astype(jnp.float32) * two_pi) * w     # (rows, E)
        if fast_sincos:
            return _sincos(proj)
        return jnp.sin(proj), jnp.cos(proj)

    def write(r0, rows_n, s, c):
        # Two dense 128-multiple lane-wide stores (no masked vst.msk).
        o_ref[pl.ds(r0, rows_n), :emb] = s.astype(o_ref.dtype)
        o_ref[pl.ds(r0, rows_n), emb:] = c.astype(o_ref.dtype)

    if rows > row_chunk and rows % row_chunk == 0:
        # Bound live ranges of the (rows, E) temporaries: stream row chunks.
        n_chunks = rows // row_chunk

        def body(i, carry):
            r0 = pl.multiple_of(i * row_chunk, row_chunk)
            s, c = compute(x_ref[pl.ds(r0, row_chunk), :])
            write(r0, row_chunk, s, c)
            return carry

        lax.fori_loop(0, n_chunks, body, 0, unroll=False)
    else:
        s, c = compute(x_ref[...])
        write(0, rows, s, c)


# ----------------------------------------------------------------------------
# Wrapper
# ----------------------------------------------------------------------------

def _round_up(n, m):
    return ((n + m - 1) // m) * m


def gaussian_fourier_projection(x, W, *, block_b=4096, row_chunk=256,
                                out_dtype=jnp.float32, fast_sincos=True):
    """x: (B,) noise levels; W: (E,) fixed Gaussian weights -> (B, 2E)."""
    x = jnp.asarray(x)
    W = jnp.asarray(W)
    B = x.shape[0]
    E = W.shape[0]
    x2 = x.reshape(B, 1).astype(jnp.float32)
    w2 = W.reshape(1, E).astype(jnp.float32)
    kernel = functools.partial(_gfp_kernel, emb=E, row_chunk=row_chunk,
                               fast_sincos=fast_sincos)

    # Small batches: single fused call, whole problem resident in VMEM.
    if B <= 256:
        return pl.pallas_call(
            kernel,
            out_shape=jax.ShapeDtypeStruct((B, 2 * E), out_dtype),
        )(x2, w2)

    # Tiled path: pad B to a tile multiple (never a single giant VMEM block for
    # ragged large batches) and give the "parallel" grid >=2 steps so v7x's two
    # TensorCores both engage.  Tile grows with B, capped at block_b.
    tile_b = max(row_chunk, min(block_b, _round_up(pl.cdiv(B, 8), row_chunk)))
    Bp = _round_up(B, tile_b)
    if Bp != B:
        x2 = jnp.pad(x2, ((0, Bp - B), (0, 0)))
    grid = Bp // tile_b

    # Explicit VMEM budget: double-buffered output tile + lane-padded x tile
    # (a (tile_b,1) f32 block pads to tile_b x 128 lanes) + W + slack.
    out_tile_bytes = tile_b * 2 * E * jnp.dtype(out_dtype).itemsize
    x_tile_bytes = tile_b * 128 * 4
    w_bytes = 8 * _round_up(E, 128) * 4
    vmem_limit = min(2 * (out_tile_bytes + x_tile_bytes) + 2 * w_bytes + (8 << 20),
                     64 << 20)

    out = pl.pallas_call(
        kernel,
        out_shape=jax.ShapeDtypeStruct((Bp, 2 * E), out_dtype),
        grid_spec=pltpu.PrefetchScalarGridSpec(
            num_scalar_prefetch=0,
            grid=(grid,),
            in_specs=[pl.BlockSpec((tile_b, 1), lambda i: (i, 0)),
                      pl.BlockSpec((1, E), lambda i: (0, 0))],
            out_specs=pl.BlockSpec((tile_b, 2 * E), lambda i: (i, 0))),
        compiler_params=pltpu.CompilerParams(
            dimension_semantics=("parallel",),
            vmem_limit_bytes=int(vmem_limit)),
    )(x2, w2)
    return out[:B] if Bp != B else out


# ----------------------------------------------------------------------------
# Pure-JAX reference (mirrors the PyTorch forward)
# ----------------------------------------------------------------------------

def reference_forward(x, W):
    x_proj = x[:, None] * W[None, :] * 2.0 * np.pi
    return jnp.concatenate([jnp.sin(x_proj), jnp.cos(x_proj)], axis=-1)


# ----------------------------------------------------------------------------
# Main
# ----------------------------------------------------------------------------

if __name__ == "__main__":
    embedding_size = 256          # module default
    scale = 1.0                   # module default

    key = jax.random.PRNGKey(0)
    k_w, k_x1, k_x2 = jax.random.split(key, 3)

    # W = randn(embedding_size) * scale  (fixed, non-trainable)
    W = jax.random.normal(k_w, (embedding_size,), jnp.float32) * scale

    # --- small batch (single-step path), matches the module's typical use ---
    B1 = 2
    x1 = jax.random.uniform(k_x1, (B1,), jnp.float32, minval=0.01, maxval=1.0)
    out1 = jax.block_until_ready(gaussian_fourier_projection(x1, W))
    ref1 = jax.block_until_ready(reference_forward(x1, W))
    assert out1.shape == (B1, 2 * embedding_size)
    if not bool(jnp.allclose(out1, ref1, rtol=1e-5, atol=1e-5)):
        raise AssertionError("Pallas output (small batch) does not match reference")

    # --- ragged larger batch: exercises padded/tiled path + row-chunked loop ---
    B2 = 4600
    x2 = jax.random.uniform(k_x2, (B2,), jnp.float32, minval=0.01, maxval=1.0)
    out2 = jax.block_until_ready(gaussian_fourier_projection(x2, W))
    ref2 = jax.block_until_ready(reference_forward(x2, W))
    assert out2.shape == (B2, 2 * embedding_size)
    if not bool(jnp.allclose(out2, ref2, rtol=1e-5, atol=1e-5)):
        raise AssertionError("Pallas output (tiled batch) does not match reference")

    print("KERNEL_OK")
</pallas_src>

<mosaic_0001>
module attributes {stable_mosaic.version = 11 : i64} {
  func.func @_gfp_kernel(%arg0: memref<2x1xf32, #tpu.memory_space<vmem>>, %arg1: memref<1x256xf32, #tpu.memory_space<vmem>>, %arg2: memref<2x512xf32, #tpu.memory_space<vmem>>) attributes {dimension_semantics = [], scalar_prefetch = 0 : i64, scratch_operands = 0 : i64, tpu.core_type = #tpu.core_type<tc>} {
    %c0 = arith.constant 0 : index
    %c0_0 = arith.constant 0 : index
    %0 = vector.load %arg1[%c0, %c0_0] : memref<1x256xf32, #tpu.memory_space<vmem>>, vector<1x256xf32>
    %c0_1 = arith.constant 0 : index
    %c0_2 = arith.constant 0 : index
    %1 = vector.load %arg0[%c0_1, %c0_2] : memref<2x1xf32, #tpu.memory_space<vmem>>, vector<2x1xf32>
    %cst = arith.constant 6.28318548 : f32
    %2 = vector.broadcast %cst : f32 to vector<2x1xf32>
    %3 = arith.mulf %1, %2 : vector<2x1xf32>
    %4 = vector.broadcast %3 : vector<2x1xf32> to vector<2x256xf32>
    %5 = vector.broadcast %0 : vector<1x256xf32> to vector<2x256xf32>
    %6 = arith.mulf %4, %5 : vector<2x256xf32>
    %cst_3 = arith.constant 0.636619746 : f32
    %7 = vector.broadcast %cst_3 : f32 to vector<2x256xf32>
    %8 = arith.mulf %6, %7 : vector<2x256xf32>
    %cst_4 = arith.constant 5.000000e-01 : f32
    %9 = vector.broadcast %cst_4 : f32 to vector<2x256xf32>
    %10 = arith.addf %8, %9 : vector<2x256xf32>
    %11 = math.floor %10 : vector<2x256xf32>
    %cst_5 = arith.constant 1.5703125 : f32
    %12 = vector.broadcast %cst_5 : f32 to vector<2x256xf32>
    %13 = arith.mulf %11, %12 : vector<2x256xf32>
    %14 = arith.subf %6, %13 : vector<2x256xf32>
    %cst_6 = arith.constant 4.83751297E-4 : f32
    %15 = vector.broadcast %cst_6 : f32 to vector<2x256xf32>
    %16 = arith.mulf %11, %15 : vector<2x256xf32>
    %17 = arith.subf %14, %16 : vector<2x256xf32>
    %cst_7 = arith.constant 7.549790e-08 : f32
    %18 = vector.broadcast %cst_7 : f32 to vector<2x256xf32>
    %19 = arith.mulf %11, %18 : vector<2x256xf32>
    %20 = arith.subf %17, %19 : vector<2x256xf32>
    %21 = arith.fptosi %11 : vector<2x256xf32> to vector<2x256xi32>
    %22 = arith.mulf %20, %20 : vector<2x256xf32>
    %cst_8 = arith.constant -1.95152956E-4 : f32
    %23 = vector.broadcast %cst_8 : f32 to vector<2x256xf32>
    %24 = arith.mulf %23, %22 : vector<2x256xf32>
    %cst_9 = arith.constant 0.00833216123 : f32
    %25 = vector.broadcast %cst_9 : f32 to vector<2x256xf32>
    %26 = arith.addf %24, %25 : vector<2x256xf32>
    %27 = arith.mulf %26, %22 : vector<2x256xf32>
    %cst_10 = arith.constant -0.166666552 : f32
    %28 = vector.broadcast %cst_10 : f32 to vector<2x256xf32>
    %29 = arith.addf %27, %28 : vector<2x256xf32>
    %30 = arith.mulf %20, %22 : vector<2x256xf32>
    %31 = arith.mulf %30, %29 : vector<2x256xf32>
    %32 = arith.addf %20, %31 : vector<2x256xf32>
    %cst_11 = arith.constant 2.44331568E-5 : f32
    %33 = vector.broadcast %cst_11 : f32 to vector<2x256xf32>
    %34 = arith.mulf %33, %22 : vector<2x256xf32>
    %cst_12 = arith.constant -0.00138873165 : f32
    %35 = vector.broadcast %cst_12 : f32 to vector<2x256xf32>
    %36 = arith.addf %34, %35 : vector<2x256xf32>
    %37 = arith.mulf %36, %22 : vector<2x256xf32>
    %cst_13 = arith.constant 0.0416666456 : f32
    %38 = vector.broadcast %cst_13 : f32 to vector<2x256xf32>
    %39 = arith.addf %37, %38 : vector<2x256xf32>
    %cst_14 = arith.constant 5.000000e-01 : f32
    %40 = vector.broadcast %cst_14 : f32 to vector<2x256xf32>
    %41 = arith.mulf %40, %22 : vector<2x256xf32>
    %cst_15 = arith.constant 1.000000e+00 : f32
    %42 = vector.broadcast %cst_15 : f32 to vector<2x256xf32>
    %43 = arith.subf %42, %41 : vector<2x256xf32>
    %44 = arith.mulf %22, %22 : vector<2x256xf32>
    %45 = arith.mulf %44, %39 : vector<2x256xf32>
    %46 = arith.addf %43, %45 : vector<2x256xf32>
    %c1_i32 = arith.constant 1 : i32
    %47 = vector.broadcast %c1_i32 : i32 to vector<2x256xi32>
    %48 = arith.andi %21, %47 : vector<2x256xi32>
    %c1_i32_16 = arith.constant 1 : i32
    %49 = vector.broadcast %c1_i32_16 : i32 to vector<2x256xi32>
    %50 = arith.cmpi eq, %48, %49 : vector<2x256xi32>
    %c2_i32 = arith.constant 2 : i32
    %51 = vector.broadcast %c2_i32 : i32 to vector<2x256xi32>
    %52 = arith.andi %21, %51 : vector<2x256xi32>
    %c2_i32_17 = arith.constant 2 : i32
    %53 = vector.broadcast %c2_i32_17 : i32 to vector<2x256xi32>
    %54 = arith.cmpi eq, %52, %53 : vector<2x256xi32>
    %c1_i32_18 = arith.constant 1 : i32
    %55 = vector.broadcast %c1_i32_18 : i32 to vector<2x256xi32>
    %56 = arith.addi %21, %55 : vector<2x256xi32>
    %c2_i32_19 = arith.constant 2 : i32
    %57 = vector.broadcast %c2_i32_19 : i32 to vector<2x256xi32>
    %58 = arith.andi %56, %57 : vector<2x256xi32>
    %c2_i32_20 = arith.constant 2 : i32
    %59 = vector.broadcast %c2_i32_20 : i32 to vector<2x256xi32>
    %60 = arith.cmpi eq, %58, %59 : vector<2x256xi32>
    %61 = arith.select %50, %46, %32 : vector<2x256xi1>, vector<2x256xf32>
    %62 = arith.select %50, %32, %46 : vector<2x256xi1>, vector<2x256xf32>
    %cst_21 = arith.constant 0.000000e+00 : f32
    %63 = vector.broadcast %cst_21 : f32 to vector<2x256xf32>
    %64 = arith.subf %63, %61 : vector<2x256xf32>
    %65 = arith.select %54, %64, %61 : vector<2x256xi1>, vector<2x256xf32>
    %cst_22 = arith.constant 0.000000e+00 : f32
    %66 = vector.broadcast %cst_22 : f32 to vector<2x256xf32>
    %67 = arith.subf %66, %62 : vector<2x256xf32>
    %68 = arith.select %60, %67, %62 : vector<2x256xi1>, vector<2x256xf32>
    %c0_23 = arith.constant 0 : index
    %c0_24 = arith.constant 0 : index
    %69 = vector.load %arg2[%c0_23, %c0_24] : memref<2x512xf32, #tpu.memory_space<vmem>>, vector<2x256xf32>
    tpu.vector_store %arg2[%c0_23, %c0_24], %65 {strides = array<i32>} : memref<2x512xf32, #tpu.memory_space<vmem>>, vector<2x256xf32>,
    %c0_25 = arith.constant 0 : index
    %c256 = arith.constant 256 : index
    %70 = vector.load %arg2[%c0_25, %c256] : memref<2x512xf32, #tpu.memory_space<vmem>>, vector<2x256xf32>
    tpu.vector_store %arg2[%c0_25, %c256], %68 {strides = array<i32>} : memref<2x512xf32, #tpu.memory_space<vmem>>, vector<2x256xf32>,
    return
  }
}

</mosaic_0001>

<bundles_post_ra>
// kernel: tpu_custom_call.1
= control target key start
LH: loop header
LB: loop body
LE: loop exit
PB: predicated region body
PF: predicated region fallthrough
CT: control target
= control target key end

     0   :  { %v184_v1 = vmov 0   ;;  %s219_s0 = inlined_call_operand.vmem [shape: f32[2,1], index: 0, kind: input, shape index: {}]   ;;  %s220_s1 = inlined_call_operand.vmem [shape: f32[1,256], index: 1, kind: input, shape index: {}]   ;;  %s221_s2 = inlined_call_operand.hbm [shape: f32[2,512], index: 2, kind: output, shape index: {}]  }
   0x1   :  { %v13_v0 = vld [vmem:[%s219_s0] sm:$0x3]  ;;  %159 = vset.pattern.permute.xlu0 %v184_v1 }
   0x2   :  { %v14_v2 = vmul.f32 6.2831855, %v13_v0 }
   0x3   :  { %7 = vsyncpa [#allocation3], 0  ;;  %v21_v3 = vlaneseq  ;;  %v12_v7 = vld [vmem:[%s220_s1] sm:$0x3]  ;;  %s185_s0 = smov [#allocation2]  }
   0x4   :  { %17 = vperm.xlu0 %159, %v14_v2   ;;  %s143_s1 = sshll.u32 %s185_s0, 4  ;;  %s144_s1 = int_to_ptr.vmem [resolvable:$true] %s143_s1 }
   0x5   :  { %v22_v4 = vshrl.u32 %v21_v3, 7  ;;  %s160_s13 = scalar_lea.vmem %s144_s1, 128  ;;  %p165_p1 = scmp.lt.s32.totalorder %s144_s1, %s144_s1 }
   0x6   :  { %p161_p0 = scmp.ne.s32.totalorder %s144_s1, %s160_s13  ;;  %p166_p2 = scmp.lt.s32.totalorder %s160_s13, %s160_s13 }
   0x7   :  { %v23_v5 = vsub.s32 0, %v22_v4  ;;  %v27_v6 = vsub.s32 1, %v22_v4 }
   0x8   :  { %p167_p3 = por %p166_p2, %p165_p1 }
   0x9   :  { %v24_v8 = vrot.slane %v12_v7, %v23_v5  ;;  %v28_v9 = vrot.slane %v12_v7, %v27_v6 }
   0xa   :  { %p168_p4 = pnand %p167_p3, %p161_p0 }
  0x83   :  { %v18_v10 = vpop.permute.xlu0 %17 }
  0x84   :  { %v31_v11 = vmul.f32 %v24_v8, %v18_v10  ;;  %v32_v12 = vmul.f32 %v28_v9, %v18_v10 }
  0x86   :  { %v33_v13 = vmul.f32 0.63661975, %v31_v11  ;;  %v34_v14 = vmul.f32 0.63661975, %v32_v12 }
  0x88   :  { %v35_v15 = vadd.f32 0.5, %v33_v13  ;;  %v36_v16 = vadd.f32 0.5, %v34_v14 }
  0x8a   :  { %v37_v17 = vfloor.f32 %v35_v15  ;;  %v38_v18 = vfloor.f32 %v36_v16 }
  0x8c   :  { %v39_v19 = vmul.f32 1.5703125, %v37_v17  ;;  %v40_v20 = vmul.f32 1.5703125, %v38_v18  ;;  %v43_v23 = vmul.f32 0.0004837513, %v37_v17  ;;  %v44_v24 = vmul.f32 0.0004837513, %v38_v18 }
  0x8d   :  { %v47_v27 = vmul.f32 7.54979e-08, %v37_v17  ;;  %v48_v28 = vmul.f32 7.54979e-08, %v38_v18  ;;  %v153_v31 = vtrunc.f32 %v37_v17  ;;  %v155_v32 = vtrunc.f32 %v38_v18 }
  0x8e   :  { %v41_v21 = vsub.f32 %v31_v11, %v39_v19  ;;  %v42_v22 = vsub.f32 %v32_v12, %v40_v20 }
  0x8f   :  { %v154_v35 = vcvt.f32.s32 %v153_v31  ;;  %v156_v36 = vcvt.f32.s32 %v155_v32 }
  0x90   :  { %v45_v25 = vsub.f32 %v41_v21, %v43_v23  ;;  %v46_v26 = vsub.f32 %v42_v22, %v44_v24 }
  0x91   :  { %v95_v47 = vadd.s32 1, %v154_v35  ;;  %v96_v48 = vadd.s32 1, %v156_v36  ;;  %v87_v63 = vand.u32 1, %v154_v35  ;;  %v88_v0 = vand.u32 1, %v156_v36 }
  0x92   :  { %v49_v29 = vsub.f32 %v45_v25, %v47_v27  ;;  %v50_v30 = vsub.f32 %v46_v26, %v48_v28  ;;  %v91_v7 = vand.u32 2, %v154_v35  ;;  %v92_v8 = vand.u32 2, %v156_v36 }
  0x93   :  { %v97_v11 = vand.u32 2, %v95_v47  ;;  %v98_v12 = vand.u32 2, %v96_v48  ;;  %vm89_vm0 = vcmp.eq.s32.totalorder %v87_v63, 1  ;;  %vm90_vm1 = vcmp.eq.s32.totalorder %v88_v0, 1 }
  0x94   :  { %v53_v33 = vmul.f32 %v49_v29, %v49_v29  ;;  %v54_v34 = vmul.f32 %v50_v30, %v50_v30  ;;  %vm93_vm2 = vcmp.eq.s32.totalorder %v91_v7, 2  ;;  %vm94_vm3 = vcmp.eq.s32.totalorder %v92_v8, 2 }
  0x95   :  { %vm99_vm4 = vcmp.eq.s32.totalorder %v97_v11, 2  ;;  %vm100_vm5 = vcmp.eq.s32.totalorder %v98_v12, 2 }
  0x96   :  { %v55_v37 = vmul.f32 -0.00019515296, %v53_v33  ;;  %v56_v38 = vmul.f32 -0.00019515296, %v54_v34  ;;  %v69_v39 = vmul.f32 2.4433157e-05, %v53_v33  ;;  %v63_v55 = vmul.f32 %v53_v33, %v49_v29 }
  0x97   :  { %v70_v40 = vmul.f32 2.4433157e-05, %v54_v34  ;;  %v77_v51 = vmul.f32 0.5, %v53_v33  ;;  %v78_v52 = vmul.f32 0.5, %v54_v34  ;;  %v64_v56 = vmul.f32 %v54_v34, %v50_v30 }
  0x98   :  { %v57_v41 = vadd.f32 0.008332161, %v55_v37  ;;  %v58_v42 = vadd.f32 0.008332161, %v56_v38  ;;  %v71_v43 = vadd.f32 -0.0013887316, %v69_v39  ;;  %v81_v59 = vmul.f32 %v53_v33, %v53_v33 }
  0x99   :  { %v72_v44 = vadd.f32 -0.0013887316, %v70_v40  ;;  %v82_v60 = vmul.f32 %v54_v34, %v54_v34  ;;  %v79_v1 = vsub.f32 1.0, %v77_v51  ;;  %v80_v2 = vsub.f32 1.0, %v78_v52 }
  0x9a   :  { %v59_v45 = vmul.f32 %v57_v41, %v53_v33  ;;  %v60_v46 = vmul.f32 %v58_v42, %v54_v34  ;;  %v73_v49 = vmul.f32 %v71_v43, %v53_v33 }
  0x9b   :  { %v74_v50 = vmul.f32 %v72_v44, %v54_v34 }
  0x9c   :  { %v61_v53 = vadd.f32 -0.16666655, %v59_v45  ;;  %v62_v54 = vadd.f32 -0.16666655, %v60_v46  ;;  %v75_v57 = vadd.f32 0.041666646, %v73_v49 }
  0x9d   :  { %v76_v58 = vadd.f32 0.041666646, %v74_v50 }
  0x9e   :  { %v65_v61 = vmul.f32 %v63_v55, %v61_v53  ;;  %v66_v62 = vmul.f32 %v64_v56, %v62_v54  ;;  %v83_v3 = vmul.f32 %v81_v59, %v75_v57 }
  0x9f   :  { %v84_v4 = vmul.f32 %v82_v60, %v76_v58 }
  0xa0   :  { %v67_v5 = vadd.f32 %v65_v61, %v49_v29  ;;  %v68_v6 = vadd.f32 %v66_v62, %v50_v30  ;;  %v85_v9 = vadd.f32 %v83_v3, %v79_v1 }
  0xa1   :  { %v86_v10 = vadd.f32 %v84_v4, %v80_v2 }
  0xa2   :  { %v101_v13 = vsel %vm89_vm0, %v85_v9, %v67_v5  ;;  %v103_v15 = vsel %vm89_vm0, %v67_v5, %v85_v9 }
  0xa3   :  { %v102_v14 = vsel %vm90_vm1, %v86_v10, %v68_v6  ;;  %v104_v16 = vsel %vm90_vm1, %v68_v6, %v86_v10  ;;  %v105_v17 = vsub.f32 0.0, %v101_v13  ;;  %v109_v19 = vsub.f32 0.0, %v103_v15 }
  0xa4   :  { %v106_v18 = vsub.f32 0.0, %v102_v14  ;;  %v110_v20 = vsub.f32 0.0, %v104_v16 }
  0xa5   :  { %v107_v21 = vsel %vm93_vm2, %v105_v17, %v101_v13  ;;  %v111_v23 = vsel %vm99_vm4, %v109_v19, %v103_v15 }
  0xa6   :  { %v108_v22 = vsel %vm94_vm3, %v106_v18, %v102_v14  ;;  %v112_v24 = vsel %vm100_vm5, %v110_v20, %v104_v16 }
  0xa7   :  { %v115_v25 = vcombine.low %v107_v21, %v108_v22  ;;  %v127_v26 = vcombine.low %v111_v23, %v112_v24 }
  0xa9   :  { %151 = vst.sshfl [vmem:[#allocation2] sm:$0x33 pattern:$0x76325410] %v115_v25 }
  0xaa   :  { %152 = vst.sshfl [vmem:[#allocation2 + $0x4] sm:$0x33 pattern:$0x76325410] %v127_v26 }
  0xab   :  { %171 = shalt.err (!%p168_p4)
}
  0xac   :  { %s172_s16 = scalar_lea.hbm %s221_s2, 128 }
  0xad   :  { %p173_p5 = scmp.ne.s32.totalorder %s221_s2, %s172_s16  ;;  %p176_p6 = scmp.lt.u32.totalorder %s172_s16, %s221_s2 }
  0xaf   :  { %p178_p7 = pnand %p176_p6, %p173_p5 }
  0xb1   :  { %181 = shalt.err (!%p178_p7)
}
  0xb2   :  { %146 = dma.vmem_to_hbm [thread:$0]  %s144_s1, 128, %s221_s2, [#allocation3]  }
  0xb3   :  { %182 = dma.done.wait [#allocation3], 128  }
  0xb4   :  { %183 = vsyncadd [#allocation3], 4294967168 }
  0xb5   :  { %150 = vsyncpa [#allocation3], 1 }

</bundles_post_ra>
